<compile_context>
chip_gen: v7x
topology: tpu7x:2x2x1
jax: 0.10.0
libtpu: 0.0.40
codegen_flags: <defaults>
</compile_context>

<pallas_src>
import functools

import jax
import jax.numpy as jnp
from jax.experimental import pallas as pl
from jax.experimental.pallas import tpu as pltpu


_NEG_PAD = -1e30  # bias value for padded output columns; exp underflows to 0


def _round_up(v, m):
    return ((v + m - 1) // m) * m


def mlp_kernel(x_ref, w1_ref, b1_ref, w2_ref, b2_ref, o_ref):
    # Hidden layer: relu(x @ W1 + b1).  Bias stays a (1, hid) sublane-broadcast read.
    h = jnp.dot(x_ref[...], w1_ref[...], preferred_element_type=jnp.float32)
    h = jnp.maximum(h + b1_ref[...], 0.0)
    # Output layer: h @ W2 + b2 (padded columns carry bias=-1e30 -> ~ -inf logits).
    logits = jnp.dot(h, w2_ref[...], preferred_element_type=jnp.float32)
    logits = logits + b2_ref[...]
    # Numerically stable log_softmax over the feature axis.  exp/log run on the EUP
    # slot, off the critical VALU path.
    m = jnp.max(logits, axis=1, keepdims=True)
    shifted = logits - m
    lse = jnp.log(jnp.sum(jnp.exp(shifted), axis=1, keepdims=True))
    o_ref[...] = (shifted - lse).astype(o_ref.dtype)


@functools.partial(jax.jit, static_argnames=("tile_n",))
def mlp_forward(x, w1, b1, w2, b2, *, tile_n=256):
    n, in_dim = x.shape
    hid_dim = w1.shape[1]
    out_dim = w2.shape[1]

    # ---- pad feature dims to 128-lane multiples (full MXU depth, lane-dense out) ----
    in_p = _round_up(in_dim, 128)
    hid_p = _round_up(hid_dim, 128)
    out_p = _round_up(out_dim, 128)

    # ---- pick batch tile: multiple of 8 sublanes, clamp to (padded) batch size ----
    tile_n = max(8, min(tile_n, _round_up(n, 8)))
    n_p = _round_up(n, tile_n)

    f32 = jnp.float32
    xp = jnp.pad(x.astype(f32), ((0, n_p - n), (0, in_p - in_dim)))
    w1p = jnp.pad(w1.astype(f32), ((0, in_p - in_dim), (0, hid_p - hid_dim)))
    b1p = jnp.pad(b1.astype(f32), ((0, 0), (0, hid_p - hid_dim)))
    w2p = jnp.pad(w2.astype(f32), ((0, hid_p - hid_dim), (0, out_p - out_dim)))
    # Padded logit columns get a huge negative bias so they never affect max / lse.
    b2p = jnp.pad(b2.astype(f32), ((0, 0), (0, out_p - out_dim)),
                  constant_values=_NEG_PAD)

    grid = (n_p // tile_n,)

    # VMEM budget: double-buffered x & out tiles + resident weights/biases +
    # the f32 hidden intermediate; 2x headroom, capped safely under v7x's 64 MiB.
    vmem_need = 4 * (2 * tile_n * in_p + 2 * tile_n * out_p + tile_n * hid_p
                     + in_p * hid_p + hid_p * out_p + hid_p + out_p)
    vmem_limit = int(min(max(2 * vmem_need, 32 * 1024 * 1024), 56 * 1024 * 1024))

    cost = pl.CostEstimate(
        flops=2 * n_p * (in_p * hid_p + hid_p * out_p),
        transcendentals=n_p * (out_p + 1),
        bytes_accessed=4 * (n_p * in_p + in_p * hid_p + hid_p * out_p
                            + hid_p + out_p + n_p * out_p),
    )

    out_padded = pl.pallas_call(
        mlp_kernel,
        out_shape=jax.ShapeDtypeStruct((n_p, out_p), jnp.float32),
        grid_spec=pltpu.PrefetchScalarGridSpec(
            num_scalar_prefetch=0,
            grid=grid,
            in_specs=[
                pl.BlockSpec((tile_n, in_p), lambda i: (i, 0)),   # x: tiled over batch
                pl.BlockSpec((in_p, hid_p), lambda i: (0, 0)),    # W1: resident
                pl.BlockSpec((1, hid_p), lambda i: (0, 0)),       # b1: resident
                pl.BlockSpec((hid_p, out_p), lambda i: (0, 0)),   # W2: resident
                pl.BlockSpec((1, out_p), lambda i: (0, 0)),       # b2: resident
            ],
            out_specs=pl.BlockSpec((tile_n, out_p), lambda i: (i, 0)),
        ),
        compiler_params=pltpu.CompilerParams(
            dimension_semantics=("parallel",),   # independent batch tiles -> 2 TCs on v7x
            vmem_limit_bytes=vmem_limit,
        ),
        cost_estimate=cost,
    )(xp, w1p, b1p, w2p, b2p)

    # Strip batch / feature padding outside the kernel (keeps the store lane-dense).
    return out_padded[:n, :out_dim]


def init_params(key, in_dim, hid_dim, out_dim):
    k1, k2, k3, k4 = jax.random.split(key, 4)
    # Deterministic synthetic init (uniform fan-in scaled, like nn.Linear default).
    bound1 = 1.0 / (in_dim ** 0.5)
    bound2 = 1.0 / (hid_dim ** 0.5)
    w1 = jax.random.uniform(k1, (in_dim, hid_dim), jnp.float32, -bound1, bound1)
    b1 = jax.random.uniform(k2, (1, hid_dim), jnp.float32, -bound1, bound1)
    w2 = jax.random.uniform(k3, (hid_dim, out_dim), jnp.float32, -bound2, bound2)
    b2 = jax.random.uniform(k4, (1, out_dim), jnp.float32, -bound2, bound2)
    return w1, b1, w2, b2


if __name__ == "__main__":
    key = jax.random.PRNGKey(0)
    kx, kp = jax.random.split(key)

    N, IN_DIM, HID_DIM, OUT_DIM = 8, 32, 64, 16
    x = jax.random.normal(kx, (N, IN_DIM), jnp.float32)
    w1, b1, w2, b2 = init_params(kp, IN_DIM, HID_DIM, OUT_DIM)

    out = mlp_forward(x, w1, b1, w2, b2)
    out = jax.block_until_ready(out)

    # Pure-JAX reference check (unpadded).
    h_ref = jnp.maximum(x @ w1 + b1, 0.0)
    logits_ref = h_ref @ w2 + b2
    ref = jax.nn.log_softmax(logits_ref, axis=1)
    assert out.shape == (N, OUT_DIM), f"bad shape {out.shape}"
    assert jnp.allclose(out, ref, atol=1e-5, rtol=1e-5), "mismatch vs reference"

    print("KERNEL_OK")
</pallas_src>

<mosaic_0001>
module attributes {stable_mosaic.version = 11 : i64} {
  func.func @mlp_kernel(%arg0: i32, %arg1: memref<8x128xf32, #tpu.memory_space<vmem>>, %arg2: memref<128x128xf32, #tpu.memory_space<vmem>>, %arg3: memref<1x128xf32, #tpu.memory_space<vmem>>, %arg4: memref<128x128xf32, #tpu.memory_space<vmem>>, %arg5: memref<1x128xf32, #tpu.memory_space<vmem>>, %arg6: memref<8x128xf32, #tpu.memory_space<vmem>>) attributes {dimension_semantics = [#tpu.dimension_semantics<parallel>], iteration_bounds = array<i64: 1>, scalar_prefetch = 0 : i64, scratch_operands = 0 : i64, tpu.core_type = #tpu.core_type<tc>, window_params = [{transform_indices = @transform_0, window_bounds = array<i64: 8, 128>}, {pipeline_mode = #tpu.pipeline_mode<synchronous>, transform_indices = @transform_1, window_bounds = array<i64: 128, 128>}, {pipeline_mode = #tpu.pipeline_mode<synchronous>, transform_indices = @transform_2, window_bounds = array<i64: 1, 128>}, {pipeline_mode = #tpu.pipeline_mode<synchronous>, transform_indices = @transform_3, window_bounds = array<i64: 128, 128>}, {pipeline_mode = #tpu.pipeline_mode<synchronous>, transform_indices = @transform_4, window_bounds = array<i64: 1, 128>}, {transform_indices = @transform_5, window_bounds = array<i64: 8, 128>}]} {
    %c0 = arith.constant 0 : index
    %c0_0 = arith.constant 0 : index
    %0 = vector.load %arg1[%c0, %c0_0] : memref<8x128xf32, #tpu.memory_space<vmem>>, vector<8x128xf32>
    %c0_1 = arith.constant 0 : index
    %c0_2 = arith.constant 0 : index
    %1 = vector.load %arg2[%c0_1, %c0_2] : memref<128x128xf32, #tpu.memory_space<vmem>>, vector<128x128xf32>
    %cst = arith.constant dense<0.000000e+00> : vector<8x128xf32>
    %2 = tpu.matmul %0, %1, %cst {dimension_numbers = #tpu.dot_dimension_numbers<[1], [0], [0], [1], [0, 0, 1, 1], [], []>} : vector<8x128xf32>, vector<128x128xf32>, vector<8x128xf32> -> vector<8x128xf32>
    %c0_3 = arith.constant 0 : index
    %c0_4 = arith.constant 0 : index
    %3 = vector.load %arg3[%c0_3, %c0_4] : memref<1x128xf32, #tpu.memory_space<vmem>>, vector<1x128xf32>
    %4 = vector.broadcast %3 : vector<1x128xf32> to vector<8x128xf32>
    %5 = arith.addf %2, %4 : vector<8x128xf32>
    %cst_5 = arith.constant 0.000000e+00 : f32
    %6 = vector.broadcast %cst_5 : f32 to vector<8x128xf32>
    %7 = arith.maximumf %5, %6 : vector<8x128xf32>
    %c0_6 = arith.constant 0 : index
    %c0_7 = arith.constant 0 : index
    %8 = vector.load %arg4[%c0_6, %c0_7] : memref<128x128xf32, #tpu.memory_space<vmem>>, vector<128x128xf32>
    %cst_8 = arith.constant dense<0.000000e+00> : vector<8x128xf32>
    %9 = tpu.matmul %7, %8, %cst_8 {dimension_numbers = #tpu.dot_dimension_numbers<[1], [0], [0], [1], [0, 0, 1, 1], [], []>} : vector<8x128xf32>, vector<128x128xf32>, vector<8x128xf32> -> vector<8x128xf32>
    %c0_9 = arith.constant 0 : index
    %c0_10 = arith.constant 0 : index
    %10 = vector.load %arg5[%c0_9, %c0_10] : memref<1x128xf32, #tpu.memory_space<vmem>>, vector<1x128xf32>
    %11 = vector.broadcast %10 : vector<1x128xf32> to vector<8x128xf32>
    %12 = arith.addf %9, %11 : vector<8x128xf32>
    %cst_11 = arith.constant dense<0xFF800000> : vector<8xf32>
    %13 = vector.multi_reduction <maximumf>, %12, %cst_11 [1] : vector<8x128xf32> to vector<8xf32>
    %14 = vector.shape_cast %13 : vector<8xf32> to vector<8x1xf32>
    %15 = vector.broadcast %14 : vector<8x1xf32> to vector<8x128xf32>
    %16 = arith.subf %12, %15 : vector<8x128xf32>
    %17 = math.exp %16 : vector<8x128xf32>
    %cst_12 = arith.constant dense<0.000000e+00> : vector<8xf32>
    %18 = vector.multi_reduction <add>, %17, %cst_12 [1] : vector<8x128xf32> to vector<8xf32>
    %19 = vector.shape_cast %18 : vector<8xf32> to vector<8x1xf32>
    %20 = math.log %19 : vector<8x1xf32>
    %21 = vector.broadcast %20 : vector<8x1xf32> to vector<8x128xf32>
    %22 = arith.subf %16, %21 : vector<8x128xf32>
    %c0_13 = arith.constant 0 : index
    %c0_14 = arith.constant 0 : index
    %23 = vector.load %arg6[%c0_13, %c0_14] : memref<8x128xf32, #tpu.memory_space<vmem>>, vector<8x128xf32>
    tpu.vector_store %arg6[%c0_13, %c0_14], %22 {strides = array<i32>} : memref<8x128xf32, #tpu.memory_space<vmem>>, vector<8x128xf32>,
    return
  }
  func.func @transform_0(%arg0: i32) -> (i32, i32) {
    %c0_i32 = arith.constant 0 : i32
    %c0_i32_0 = arith.constant 0 : i32
    return %arg0, %c0_i32 : i32, i32
  }
  func.func @transform_1(%arg0: i32) -> (i32, i32) {
    %c0_i32 = arith.constant 0 : i32
    %c0_i32_0 = arith.constant 0 : i32
    %c0_i32_1 = arith.constant 0 : i32
    return %c0_i32, %c0_i32_0 : i32, i32
  }
  func.func @transform_2(%arg0: i32) -> (i32, i32) {
    %c0_i32 = arith.constant 0 : i32
    %c0_i32_0 = arith.constant 0 : i32
    %c0_i32_1 = arith.constant 0 : i32
    return %c0_i32, %c0_i32_0 : i32, i32
  }
  func.func @transform_3(%arg0: i32) -> (i32, i32) {
    %c0_i32 = arith.constant 0 : i32
    %c0_i32_0 = arith.constant 0 : i32
    %c0_i32_1 = arith.constant 0 : i32
    return %c0_i32, %c0_i32_0 : i32, i32
  }
  func.func @transform_4(%arg0: i32) -> (i32, i32) {
    %c0_i32 = arith.constant 0 : i32
    %c0_i32_0 = arith.constant 0 : i32
    %c0_i32_1 = arith.constant 0 : i32
    return %c0_i32, %c0_i32_0 : i32, i32
  }
  func.func @transform_5(%arg0: i32) -> (i32, i32) {
    %c0_i32 = arith.constant 0 : i32
    %c0_i32_0 = arith.constant 0 : i32
    return %arg0, %c0_i32 : i32, i32
  }
}

</mosaic_0001>

<bundles_post_ra>
// kernel: mlp_forward.1
= control target key start
LH: loop header
LB: loop body
LE: loop exit
PB: predicated region body
PF: predicated region fallthrough
CT: control target
= control target key end

     0   :  { %v420_v3 = vmov 0.0|0.0   ;;  %vm421_vm0 = vmmov 0   ;;  %v422_v6 = vmov 0.0   ;;  %s587_s0 = inlined_call_operand.vmem [shape: f32[8,128], index: 0, kind: input, shape index: {}]   ;;  %s588_s1 = inlined_call_operand.vmem [shape: f32[128,128], index: 1, kind: input, shape index: {}]   ;;  %s589_s2 = inlined_call_operand.vmem [shape: f32[1,128], index: 2, kind: input, shape index: {}]   ;;  %s590_s3 = inlined_call_operand.vmem [shape: f32[128,128], index: 3, kind: input, shape index: {}]   ;;  %s591_s4 = inlined_call_operand.vmem [shape: f32[1,128], index: 4, kind: input, shape index: {}]   ;;  %s592_s5 = inlined_call_operand.hbm [shape: f32[8,128], index: 5, kind: output, shape index: {}]  }
   0x1   :  { %v22_v0 = vld [vmem:[%s588_s1] sm:$0xff]  ;;  %v23_v1 = vld [vmem:[%s588_s1 + $0x8] sm:$0xff]  ;;  %v24_v2 = vld [vmem:[%s588_s1 + $0x10] sm:$0xff]  ;;  %340 = vmatprep.subr.bf16.mxu0 %v420_v3  ;;  %302 = vmatprep.mubr.msk.f32.mxu0 %vm421_vm0, %v422_v6 }
   0x2   :  { %v341_v4 = vpack.c.bf16 %v23_v1, %v22_v0  ;;  %v25_v5 = vld [vmem:[%s588_s1 + $0x18] sm:$0xff]  ;;  %364 = vmatprep.subr.bf16.mxu1 %v420_v3  ;;  %337 = vmatprep.mubr.msk.f32.mxu1 %vm421_vm0, %v422_v6  ;;  %v26_v8 = vld [vmem:[%s588_s1 + $0x20] sm:$0xff]  ;;  %v27_v9 = vld [vmem:[%s588_s1 + $0x28] sm:$0xff] }
   0x3   :  { %v344_v7 = vpack.c.bf16 %v25_v5, %v24_v2  ;;  %v116_v10 = vld [vmem:[%s590_s3] sm:$0xff]  ;;  %v117_v11 = vld [vmem:[%s590_s3 + $0x8] sm:$0xff]  ;;  %v118_v12 = vld [vmem:[%s590_s3 + $0x10] sm:$0xff]  ;;  %v347_v14 = vpack.c.bf16 %v27_v9, %v26_v8 }
   0x4   :  { %342 = vmatpush3.bf16.msra.mxu0 %v341_v4  ;;  %v119_v13 = vld [vmem:[%s590_s3 + $0x18] sm:$0xff]  ;;  %v365_v15 = vpack.c.bf16 %v117_v11, %v116_v10  ;;  %v28_v16 = vld [vmem:[%s588_s1 + $0x30] sm:$0xff]  ;;  %v120_v19 = vld [vmem:[%s590_s3 + $0x20] sm:$0xff] }
   0x5   :  { %343 = vmatprep.subr.bf16.mxu0 %v420_v3  ;;  %v29_v17 = vld [vmem:[%s588_s1 + $0x38] sm:$0xff]  ;;  %v368_v18 = vpack.c.bf16 %v119_v13, %v118_v12  ;;  %v121_v20 = vld [vmem:[%s590_s3 + $0x28] sm:$0xff] }
   0x6   :  { %366 = vmatpush3.bf16.msra.mxu1 %v365_v15 }
   0x7   :  { %367 = vmatprep.subr.bf16.mxu1 %v420_v3 }
   0x8   :  { %345 = vmatpush3.bf16.msra.mxu0 %v344_v7 }
   0x9   :  { %346 = vmatprep.subr.bf16.mxu0 %v420_v3 }
   0xa   :  { %10 = vsyncpa [#allocation3], 0  ;;  %v350_v21 = vpack.c.bf16 %v29_v17, %v28_v16  ;;  %v30_v22 = vld [vmem:[%s588_s1 + $0x40] sm:$0xff]  ;;  %v31_v23 = vld [vmem:[%s588_s1 + $0x48] sm:$0xff]  ;;  %369 = vmatpush3.bf16.msra.mxu1 %v368_v18  ;;  %v371_v24 = vpack.c.bf16 %v121_v20, %v120_v19 }
   0xb   :  { %370 = vmatprep.subr.bf16.mxu1 %v420_v3  ;;  %v122_v25 = vld [vmem:[%s590_s3 + $0x30] sm:$0xff]  ;;  %v123_v26 = vld [vmem:[%s590_s3 + $0x38] sm:$0xff]  ;;  %v353_v27 = vpack.c.bf16 %v31_v23, %v30_v22  ;;  %v124_v31 = vld [vmem:[%s590_s3 + $0x40] sm:$0xff] }
   0xc   :  { %348 = vmatpush3.bf16.msra.mxu0 %v347_v14  ;;  %v32_v28 = vld [vmem:[%s588_s1 + $0x50] sm:$0xff]  ;;  %v33_v29 = vld [vmem:[%s588_s1 + $0x58] sm:$0xff]  ;;  %v374_v30 = vpack.c.bf16 %v123_v26, %v122_v25  ;;  %v125_v32 = vld [vmem:[%s590_s3 + $0x48] sm:$0xff] }
   0xd   :  { %349 = vmatprep.subr.bf16.mxu0 %v420_v3  ;;  %v356_v33 = vpack.c.bf16 %v33_v29, %v32_v28  ;;  %v34_v34 = vld [vmem:[%s588_s1 + $0x60] sm:$0xff]  ;;  %v35_v35 = vld [vmem:[%s588_s1 + $0x68] sm:$0xff]  ;;  %v377_v36 = vpack.c.bf16 %v125_v32, %v124_v31  ;;  %v126_v37 = vld [vmem:[%s590_s3 + $0x50] sm:$0xff] }
   0xe   :  { %372 = vmatpush3.bf16.msra.mxu1 %v371_v24  ;;  %v127_v38 = vld [vmem:[%s590_s3 + $0x58] sm:$0xff]  ;;  %v359_v39 = vpack.c.bf16 %v35_v35, %v34_v34  ;;  %v36_v40 = vld [vmem:[%s588_s1 + $0x70] sm:$0xff]  ;;  %v128_v43 = vld [vmem:[%s590_s3 + $0x60] sm:$0xff] }
   0xf   :  { %373 = vmatprep.subr.bf16.mxu1 %v420_v3  ;;  %v37_v41 = vld [vmem:[%s588_s1 + $0x78] sm:$0xff]  ;;  %v380_v42 = vpack.c.bf16 %v127_v38, %v126_v37  ;;  %v129_v44 = vld [vmem:[%s590_s3 + $0x68] sm:$0xff]  ;;  %v21_v47 = vld [vmem:[%s587_s0] sm:$0xff] }
  0x10   :  { %351 = vmatpush3.bf16.msra.mxu0 %v350_v21  ;;  %v362_v45 = vpack.c.bf16 %v37_v41, %v36_v40  ;;  %v383_v46 = vpack.c.bf16 %v129_v44, %v128_v43  ;;  %v130_v48 = vld [vmem:[%s590_s3 + $0x70] sm:$0xff]  ;;  %v131_v49 = vld [vmem:[%s590_s3 + $0x78] sm:$0xff]  ;;  %v234_v51 = vld [vmem:[%s589_s2] ss:$0 sm:$0xff]  ;;  %s423_s2 = smov [#allocation2]  }
  0x11   :  { %352 = vmatprep.subr.bf16.mxu0 %v420_v3  ;;  %v386_v50 = vpack.c.bf16 %v131_v49, %v130_v48  ;;  %v235_v56 = vld [vmem:[%s591_s4] ss:$0 sm:$0xff]  ;;  %s226_s3 = sshll.u32 %s423_s2, 4  ;;  %s227_s3 = int_to_ptr.vmem [resolvable:$true] %s226_s3 }
  0x12   :  { %375 = vmatpush3.bf16.msra.mxu1 %v374_v30  ;;  %s396_s4 = scalar_lea.vmem %s227_s3, 128  ;;  %p401_p1 = scmp.lt.s32.totalorder %s227_s3, %s227_s3 }
  0x13   :  { %376 = vmatprep.subr.bf16.mxu1 %v420_v3  ;;  %p397_p0 = scmp.ne.s32.totalorder %s227_s3, %s396_s4  ;;  %p402_p2 = scmp.lt.s32.totalorder %s396_s4, %s396_s4 }
  0x14   :  { %354 = vmatpush3.bf16.msra.mxu0 %v353_v27 }
  0x15   :  { %355 = vmatprep.subr.bf16.mxu0 %v420_v3  ;;  %p403_p3 = por %p402_p2, %p401_p1 }
  0x16   :  { %378 = vmatpush3.bf16.msra.mxu1 %v377_v36 }
  0x17   :  { %379 = vmatprep.subr.bf16.mxu1 %v420_v3  ;;  %p404_p4 = pnand %p403_p3, %p397_p0 }
  0x18   :  { %357 = vmatpush3.bf16.msra.mxu0 %v356_v33 }
  0x19   :  { %358 = vmatprep.subr.bf16.mxu0 %v420_v3 }
  0x1a   :  { %381 = vmatpush3.bf16.msra.mxu1 %v380_v42 }
  0x1b   :  { %382 = vmatprep.subr.bf16.mxu1 %v420_v3 }
  0x1c   :  { %360 = vmatpush3.bf16.msra.mxu0 %v359_v39 }
  0x1d   :  { %361 = vmatprep.subr.bf16.mxu0 %v420_v3 }
  0x1e   :  { %384 = vmatpush3.bf16.msra.mxu1 %v383_v46 }
  0x1f   :  { %385 = vmatprep.subr.bf16.mxu1 %v420_v3 }
  0x20   :  { %363 = vmatpush3.bf16.msra.mxu0 %v362_v45 }
  0x22   :  { %387 = vmatpush3.bf16.msra.mxu1 %v386_v50 }
  0x23   :  { %303 = vmatmul.mubr.f32.vlgmr.msra.gmra.mrb[0].mxu0 %v21_v47 }
  0xf6   :  { %v111_v52 = vpop.f32.mrb[0].mxu0 }
  0xf7   :  { %v112_v53 = vadd.f32 %v234_v51, %v111_v52  ;;  %v304_v54 = vpop.f32.mrb[1].mxu0 }
  0xf9   :  { %v115_v55 = vmax.f32 %v112_v53, 0.0 }
  0xfb   :  { %338 = vmatmul.mubr.f32.vlgmr.msra.gmra.mrb[0].mxu1 %v115_v55 }
 0x1ce   :  { %v205_v57 = vpop.f32.mrb[0].mxu1 }
 0x1cf   :  { %v206_v58 = vadd.f32 %v235_v56, %v205_v57  ;;  %v339_v59 = vpop.f32.mrb[1].mxu1 }
 0x1d1   :  { %209 = vmax.xlane.f32.xlu0 %v206_v58 }
 0x25e   :  { %v210_v60 = vpop.xlane.xlu0 %209 }
 0x25f   :  { %v211_v61 = vsub.f32 %v206_v58, %v210_v60 }
 0x261   :  { %v212_v62 = vmul.f32 1.442695, %v211_v61 }
 0x263   :  { %392 = vpow2.f32 %v212_v62 }
 0x26d   :  { %v393_v63 = vpop.eup %392 }
 0x26e   :  { %214 = vadd.xlane.f32.xlu0 %v393_v63 }
 0x2fb   :  { %v215_v0 = vpop.xlane.xlu0 %214 }
 0x2fc   :  { %394 = vlog2.f32 %v215_v0 }
 0x306   :  { %v395_v1 = vpop.eup %394 }
 0x307   :  { %v217_v2 = vmul.f32 0.6931472, %v395_v1 }
 0x309   :  { %v218_v3 = vsub.f32 %v211_v61, %v217_v2 }
 0x30b   :  { %219 = vst [vmem:[#allocation2] sm:$0xff] %v218_v3 }
 0x30c   :  { %407 = shalt.err (!%p404_p4)
}
 0x30d   :  { %s408_s13 = scalar_lea.hbm %s592_s5, 128 }
 0x30e   :  { %p409_p5 = scmp.ne.s32.totalorder %s592_s5, %s408_s13  ;;  %p412_p6 = scmp.lt.u32.totalorder %s408_s13, %s592_s5 }
 0x310   :  { %p414_p7 = pnand %p412_p6, %p409_p5 }
 0x312   :  { %417 = shalt.err (!%p414_p7)
}
 0x313   :  { %229 = dma.vmem_to_hbm [thread:$0]  %s227_s3, 128, %s592_s5, [#allocation3]  }
 0x314   :  { %418 = dma.done.wait [#allocation3], 128  }
 0x315   :  { %419 = vsyncadd [#allocation3], 4294967168 }
 0x316   :  { %233 = vsyncpa [#allocation3], 1 }

</bundles_post_ra>
